<compile_context>
chip_gen: v7x
topology: tpu7x:2x2x1
jax: 0.10.0
libtpu: 0.0.40
codegen_flags: <defaults>
</compile_context>

<pallas_src>
import jax
import jax.numpy as jnp
from jax.experimental import pallas as pl
from jax.experimental.pallas import tpu as pltpu


def _gs_embed_kernel(idx_ref, table_ref, out_ref):
    # idx_ref:   (TB, L) int32 -- game-state id replicated across each H-wide lane group
    # table_ref: (V,  L) f32   -- embedding table tiled along lanes to match the layout
    # out_ref:   (TB, L) f32
    idx = idx_ref[...]
    num_states = table_ref.shape[0]
    acc = jnp.zeros(out_ref.shape, dtype=out_ref.dtype)
    # V is tiny (len(RobotState) == 4): a fully unrolled chain of VPU selects.
    for v in range(num_states):
        row = table_ref[pl.ds(v, 1), :]                 # (1, L) broadcast row
        acc = acc + jnp.where(idx == v, row, jnp.zeros((), dtype=out_ref.dtype))
    out_ref[...] = acc


def _choose_row_tile(n_rows: int, lane_width: int) -> int:
    """Pick the largest row tile that keeps double-buffered idx+out tiles ~<= 12 MiB."""
    budget = 12 * 1024 * 1024
    per_row = 2 * lane_width * (4 + 4)                  # 2 buffers x (int32 idx + f32 out)
    max_rows = max(8, budget // per_row)
    if n_rows <= max_rows:
        return n_rows                                   # full dim -> always a legal block
    return int(min(1024, (max_rows // 8) * 8))          # multiple of 8, capped


def game_state_encoder(x, embedding_table):
    """
    x:               (batch_size, num_game_states) integer array of RobotState ids
    embedding_table: (num_robot_states, hidden_dim) float32
    returns:         (batch_size, 1, num_game_states, hidden_dim) float32
                     == torch: embedding(x).unsqueeze(1)
    """
    b, g = x.shape
    v, h = embedding_table.shape
    l = g * h

    # Layout plumbing (wrapper side): present a lane-dense (B, G*H) slab to the kernel.
    #   idx_lanes[b, g*H + k]  == x[b, g]
    #   table_lane[v, g*H + k] == embedding_table[v, k]
    idx_lanes = jnp.repeat(x.astype(jnp.int32), h, axis=1)          # (B, G*H) int32
    table_lane = jnp.tile(embedding_table, (1, g))                  # (V, G*H) f32

    tile_b = _choose_row_tile(b, l)
    grid = (pl.cdiv(b, tile_b),)

    # Explicit VMEM budget: resident (double-buffered) table + double-buffered idx/out tiles.
    table_bytes = 2 * v * l * 4
    tile_bytes = 2 * 2 * tile_b * l * 4
    vmem_limit = int(max(8 * 1024 * 1024, table_bytes + tile_bytes + 4 * 1024 * 1024))

    out_flat = pl.pallas_call(
        _gs_embed_kernel,
        out_shape=jax.ShapeDtypeStruct((b, l), embedding_table.dtype),
        grid=grid,
        in_specs=[
            pl.BlockSpec((tile_b, l), lambda i: (i, 0)),            # row tile of indices
            pl.BlockSpec((v, l), lambda i: (0, 0)),                 # table resident across grid
        ],
        out_specs=pl.BlockSpec((tile_b, l), lambda i: (i, 0)),
        compiler_params=pltpu.CompilerParams(
            dimension_semantics=("parallel",),
            vmem_limit_bytes=vmem_limit,
        ),
    )(idx_lanes, table_lane)

    # Glue: (B, G*H) -> (B, G, H) -> unsqueeze(1) -> (B, 1, G, H)
    return out_flat.reshape(b, g, h)[:, None, :, :]


if __name__ == "__main__":
    # Small, module-consistent shapes.
    NUM_ROBOT_STATES = 4      # len(RobotState)
    HIDDEN_DIM = 32
    BATCH = 2
    NUM_GAME_STATES = 8

    key = jax.random.PRNGKey(0)
    k_table, k_idx = jax.random.split(key)

    # nn.Embedding weights are N(0, 1) — deterministic synthetic init.
    embedding_table = jax.random.normal(
        k_table, (NUM_ROBOT_STATES, HIDDEN_DIM), dtype=jnp.float32
    )
    x = jax.random.randint(
        k_idx, (BATCH, NUM_GAME_STATES), 0, NUM_ROBOT_STATES, dtype=jnp.int32
    )

    out = jax.block_until_ready(game_state_encoder(x, embedding_table))

    # Reference check against plain-JAX embedding lookup.
    ref = jnp.take(embedding_table, x, axis=0)[:, None, :, :]
    assert out.shape == (BATCH, 1, NUM_GAME_STATES, HIDDEN_DIM), out.shape
    assert jnp.allclose(out, ref, atol=1e-6), "mismatch vs reference embedding"

    print("KERNEL_OK")
</pallas_src>

<mosaic_0001>
module attributes {stable_mosaic.version = 11 : i64} {
  func.func @_gs_embed_kernel(%arg0: i32, %arg1: memref<2x256xi32, #tpu.memory_space<vmem>>, %arg2: memref<4x256xf32, #tpu.memory_space<vmem>>, %arg3: memref<2x256xf32, #tpu.memory_space<vmem>>) attributes {dimension_semantics = [#tpu.dimension_semantics<parallel>], iteration_bounds = array<i64: 1>, scalar_prefetch = 0 : i64, scratch_operands = 0 : i64, tpu.core_type = #tpu.core_type<tc>, window_params = [{transform_indices = @transform_0, window_bounds = array<i64: 2, 256>}, {pipeline_mode = #tpu.pipeline_mode<synchronous>, transform_indices = @transform_1, window_bounds = array<i64: 4, 256>}, {transform_indices = @transform_2, window_bounds = array<i64: 2, 256>}]} {
    %c0 = arith.constant 0 : index
    %c0_0 = arith.constant 0 : index
    %0 = vector.load %arg1[%c0, %c0_0] : memref<2x256xi32, #tpu.memory_space<vmem>>, vector<2x256xi32>
    %cst = arith.constant 0.000000e+00 : f32
    %1 = vector.broadcast %cst : f32 to vector<2x256xf32>
    %c0_1 = arith.constant 0 : index
    %c0_2 = arith.constant 0 : index
    %2 = vector.load %arg2[%c0_1, %c0_2] : memref<4x256xf32, #tpu.memory_space<vmem>>, vector<1x256xf32>
    %c0_i32 = arith.constant 0 : i32
    %3 = vector.broadcast %c0_i32 : i32 to vector<2x256xi32>
    %4 = arith.cmpi eq, %0, %3 : vector<2x256xi32>
    %cst_3 = arith.constant 0.000000e+00 : f32
    %5 = vector.shape_cast %2 : vector<1x256xf32> to vector<1x256xf32>
    %6 = vector.broadcast %5 : vector<1x256xf32> to vector<2x256xf32>
    %7 = vector.broadcast %cst_3 : f32 to vector<2x256xf32>
    %8 = arith.select %4, %6, %7 : vector<2x256xi1>, vector<2x256xf32>
    %9 = arith.addf %1, %8 : vector<2x256xf32>
    %c1 = arith.constant 1 : index
    %c0_4 = arith.constant 0 : index
    %10 = vector.load %arg2[%c1, %c0_4] : memref<4x256xf32, #tpu.memory_space<vmem>>, vector<1x256xf32>
    %c1_i32 = arith.constant 1 : i32
    %11 = vector.broadcast %c1_i32 : i32 to vector<2x256xi32>
    %12 = arith.cmpi eq, %0, %11 : vector<2x256xi32>
    %cst_5 = arith.constant 0.000000e+00 : f32
    %13 = vector.shape_cast %10 : vector<1x256xf32> to vector<1x256xf32>
    %14 = vector.broadcast %13 : vector<1x256xf32> to vector<2x256xf32>
    %15 = vector.broadcast %cst_5 : f32 to vector<2x256xf32>
    %16 = arith.select %12, %14, %15 : vector<2x256xi1>, vector<2x256xf32>
    %17 = arith.addf %9, %16 : vector<2x256xf32>
    %c2 = arith.constant 2 : index
    %c0_6 = arith.constant 0 : index
    %18 = vector.load %arg2[%c2, %c0_6] : memref<4x256xf32, #tpu.memory_space<vmem>>, vector<1x256xf32>
    %c2_i32 = arith.constant 2 : i32
    %19 = vector.broadcast %c2_i32 : i32 to vector<2x256xi32>
    %20 = arith.cmpi eq, %0, %19 : vector<2x256xi32>
    %cst_7 = arith.constant 0.000000e+00 : f32
    %21 = vector.shape_cast %18 : vector<1x256xf32> to vector<1x256xf32>
    %22 = vector.broadcast %21 : vector<1x256xf32> to vector<2x256xf32>
    %23 = vector.broadcast %cst_7 : f32 to vector<2x256xf32>
    %24 = arith.select %20, %22, %23 : vector<2x256xi1>, vector<2x256xf32>
    %25 = arith.addf %17, %24 : vector<2x256xf32>
    %c3 = arith.constant 3 : index
    %c0_8 = arith.constant 0 : index
    %26 = vector.load %arg2[%c3, %c0_8] : memref<4x256xf32, #tpu.memory_space<vmem>>, vector<1x256xf32>
    %c3_i32 = arith.constant 3 : i32
    %27 = vector.broadcast %c3_i32 : i32 to vector<2x256xi32>
    %28 = arith.cmpi eq, %0, %27 : vector<2x256xi32>
    %cst_9 = arith.constant 0.000000e+00 : f32
    %29 = vector.shape_cast %26 : vector<1x256xf32> to vector<1x256xf32>
    %30 = vector.broadcast %29 : vector<1x256xf32> to vector<2x256xf32>
    %31 = vector.broadcast %cst_9 : f32 to vector<2x256xf32>
    %32 = arith.select %28, %30, %31 : vector<2x256xi1>, vector<2x256xf32>
    %33 = arith.addf %25, %32 : vector<2x256xf32>
    %c0_10 = arith.constant 0 : index
    %c0_11 = arith.constant 0 : index
    %34 = vector.load %arg3[%c0_10, %c0_11] : memref<2x256xf32, #tpu.memory_space<vmem>>, vector<2x256xf32>
    tpu.vector_store %arg3[%c0_10, %c0_11], %33 {strides = array<i32>} : memref<2x256xf32, #tpu.memory_space<vmem>>, vector<2x256xf32>,
    return
  }
  func.func @transform_0(%arg0: i32) -> (i32, i32) {
    %c0_i32 = arith.constant 0 : i32
    %c0_i32_0 = arith.constant 0 : i32
    return %arg0, %c0_i32 : i32, i32
  }
  func.func @transform_1(%arg0: i32) -> (i32, i32) {
    %c0_i32 = arith.constant 0 : i32
    %c0_i32_0 = arith.constant 0 : i32
    %c0_i32_1 = arith.constant 0 : i32
    return %c0_i32, %c0_i32_0 : i32, i32
  }
  func.func @transform_2(%arg0: i32) -> (i32, i32) {
    %c0_i32 = arith.constant 0 : i32
    %c0_i32_0 = arith.constant 0 : i32
    return %arg0, %c0_i32 : i32, i32
  }
}

</mosaic_0001>

<bundles_post_ra>
// kernel: tpu_custom_call.1
= control target key start
LH: loop header
LB: loop body
LE: loop exit
PB: predicated region body
PF: predicated region fallthrough
CT: control target
= control target key end

     0   :  { %7 = vsyncpa [#allocation3], 0  ;;  %s276_s0 = inlined_call_operand.hbm [shape: s32[2,256], index: 0, kind: input, shape index: {}]   ;;  %s277_s1 = inlined_call_operand.hbm [shape: f32[4,256], index: 1, kind: input, shape index: {}]   ;;  %s278_s2 = inlined_call_operand.hbm [shape: f32[2,256], index: 2, kind: output, shape index: {}]  }
   0x1   :  { %8 = vsyncpa [#allocation6], 0 }
   0x2   :  { %9 = vsyncpa [#allocation4], 0  ;;  %s221_s9 = smov [#allocation2]   ;;  %s222_s11 = smov [#allocation5]  }
   0x3   :  { %s16_s10 = sshll.u32 %s221_s9, 4  ;;  %s26_s12 = sshll.u32 %s222_s11, 4  ;;  %s17_s10 = int_to_ptr.vmem [resolvable:$true] %s16_s10  ;;  %s27_s12 = int_to_ptr.vmem [resolvable:$true] %s26_s12 }
   0x4   :  { %s149_s15 = scalar_lea.hbm %s276_s0, 64 }
   0x5   :  { %p150_p0 = scmp.ne.s32.totalorder %s276_s0, %s149_s15  ;;  %p153_p1 = scmp.lt.u32.totalorder %s149_s15, %s276_s0 }
   0x7   :  { %p155_p2 = pnand %p153_p1, %p150_p0 }
   0x9   :  { %158 = shalt.err (!%p155_p2)
}
   0xa   :  { %s159_s20 = scalar_lea.vmem %s17_s10, 64  ;;  %p164_p4 = scmp.lt.s32.totalorder %s17_s10, %s17_s10 }
   0xb   :  { %p160_p3 = scmp.ne.s32.totalorder %s17_s10, %s159_s20  ;;  %p165_p5 = scmp.lt.s32.totalorder %s159_s20, %s159_s20 }
   0xd   :  { %p166_p6 = por %p165_p5, %p164_p4 }
   0xf   :  { %p167_p7 = pnand %p166_p6, %p160_p3 }
  0x11   :  { %170 = shalt.err (!%p167_p7)
}
  0x12   :  { %19 = dma.hbm_to_vmem [thread:$0]  %s276_s0, 64, %s17_s10, [#allocation3]  }
  0x13   :  { %s171_s25 = scalar_lea.hbm %s277_s1, 128 }
  0x14   :  { %p172_p8 = scmp.ne.s32.totalorder %s277_s1, %s171_s25  ;;  %p175_p9 = scmp.lt.u32.totalorder %s171_s25, %s277_s1 }
  0x16   :  { %p177_p10 = pnand %p175_p9, %p172_p8 }
  0x18   :  { %180 = shalt.err (!%p177_p10)
}
  0x19   :  { %s181_s30 = scalar_lea.vmem %s27_s12, 128  ;;  %p186_p12 = scmp.lt.s32.totalorder %s27_s12, %s27_s12 }
  0x1a   :  { %p182_p11 = scmp.ne.s32.totalorder %s27_s12, %s181_s30  ;;  %p187_p13 = scmp.lt.s32.totalorder %s181_s30, %s181_s30 }
  0x1c   :  { %p188_p0 = por %p187_p13, %p186_p12 }
  0x1e   :  { %p189_p1 = pnand %p188_p0, %p182_p11 }
  0x20   :  { %192 = shalt.err (!%p189_p1)
}
  0x21   :  { %29 = dma.hbm_to_vmem [thread:$0]  %s277_s1, 128, %s27_s12, [#allocation6]  }
  0x22   :  { %215 = dma.done.wait [#allocation3], 64  }
  0x23   :  { %216 = vsyncadd [#allocation3], 4294967232 }
  0x24   :  { %217 = dma.done.wait [#allocation6], 128  }
  0x25   :  { %218 = vsyncadd [#allocation6], 4294967168  ;;  %v40_v0 = vlaneseq  ;;  %v223_v1 = vmov 1983009808   ;;  %v36_v8 = vld [vmem:[#allocation2] sm:$0xf] }
  0x26   :  { %v50_v2 = vunpack.c.l.s4 %v223_v1  ;;  %v37_v7 = vld [vmem:[#allocation5] ss:$4 sm:$0x3]  ;;  %v60_v12 = vld [vmem:[#allocation5 + $0x1] ss:$4 sm:$0x3] }
  0x27   :  { %v41_v3 = vshrl.u32 %v40_v0, 7  ;;  %v83_v15 = vld [vmem:[#allocation5 + $0x2] ss:$4 sm:$0x3]  ;;  %vm38_vm0 = vcmp.eq.s32.totalorder %v36_v8, 0  ;;  %vm61_vm1 = vcmp.eq.s32.totalorder %v36_v8, 1 }
  0x28   :  { %v51_v6 = vunpack.c.0.s8 %v50_v2  ;;  %v106_v19 = vld [vmem:[#allocation5 + $0x3] ss:$4 sm:$0x3]  ;;  %vm84_vm2 = vcmp.eq.s32.totalorder %v36_v8, 2  ;;  %vm107_vm3 = vcmp.eq.s32.totalorder %v36_v8, 3  ;;  %s224_s1 = smov [#allocation7]  }
  0x29   :  { %v42_v4 = vsub.s32 0, %v41_v3  ;;  %v46_v5 = vsub.s32 1, %v41_v3  ;;  %s135_s4 = sshll.u32 %s224_s1, 4  ;;  %s136_s4 = int_to_ptr.vmem [resolvable:$true] %s135_s4 }
  0x2a   :  { %v54_v11 = vsub.s32 %v51_v6, %v41_v3  ;;  %s193_s5 = scalar_lea.vmem %s136_s4, 64  ;;  %p198_p3 = scmp.lt.s32.totalorder %s136_s4, %s136_s4 }
  0x2b   :  { %v43_v9 = vrot.slane %v37_v7, %v42_v4  ;;  %v47_v10 = vrot.slane %v37_v7, %v46_v5  ;;  %v66_v13 = vrot.slane %v60_v12, %v42_v4  ;;  %v70_v14 = vrot.slane %v60_v12, %v46_v5  ;;  %p194_p2 = scmp.ne.s32.totalorder %s136_s4, %s193_s5  ;;  %p199_p4 = scmp.lt.s32.totalorder %s193_s5, %s193_s5 }
  0x2c   :  { %v89_v17 = vrot.slane %v83_v15, %v42_v4  ;;  %v93_v18 = vrot.slane %v83_v15, %v46_v5  ;;  %v112_v21 = vrot.slane %v106_v19, %v42_v4  ;;  %v116_v22 = vrot.slane %v106_v19, %v46_v5 }
  0x2d   :  { %v48_v16 = vcombine.low %v43_v9, %v47_v10  ;;  %v71_v20 = vcombine.low %v66_v13, %v70_v14  ;;  %p200_p5 = por %p199_p4, %p198_p3 }
  0x2e   :  { %v94_v24 = vcombine.low %v89_v17, %v93_v18  ;;  %v117_v26 = vcombine.low %v112_v21, %v116_v22 }
  0x2f   :  { %v55_v23 = vrot.slane %v48_v16, %v54_v11  ;;  %v78_v25 = vrot.slane %v71_v20, %v54_v11  ;;  %p201_p6 = pnand %p200_p5, %p194_p2 }
  0x30   :  { %v101_v28 = vrot.slane %v94_v24, %v54_v11  ;;  %v124_v30 = vrot.slane %v117_v26, %v54_v11 }
  0x31   :  { %v57_v27 = vsel %vm38_vm0, %v55_v23, 0.0  ;;  %v80_v29 = vsel %vm61_vm1, %v78_v25, 0.0 }
  0x32   :  { %v81_v31 = vadd.f32 %v80_v29, %v57_v27  ;;  %v103_v32 = vsel %vm84_vm2, %v101_v28, 0.0  ;;  %v126_v33 = vsel %vm107_vm3, %v124_v30, 0.0 }
  0x34   :  { %v104_v34 = vadd.f32 %v103_v32, %v81_v31 }
  0x36   :  { %v127_v35 = vadd.f32 %v126_v33, %v104_v34 }
  0x38   :  { %128 = vst [vmem:[#allocation7] sm:$0xf] %v127_v35 }
  0x39   :  { %204 = shalt.err (!%p201_p6)
}
  0x3a   :  { %s205_s8 = scalar_lea.hbm %s278_s2, 64 }
  0x3b   :  { %p206_p7 = scmp.ne.s32.totalorder %s278_s2, %s205_s8  ;;  %p209_p8 = scmp.lt.u32.totalorder %s205_s8, %s278_s2 }
  0x3d   :  { %p211_p9 = pnand %p209_p8, %p206_p7 }
  0x3f   :  { %214 = shalt.err (!%p211_p9)
}
  0x40   :  { %138 = dma.vmem_to_hbm [thread:$0]  %s136_s4, 64, %s278_s2, [#allocation4]  }
  0x41   :  { %219 = dma.done.wait [#allocation4], 64  }
  0x42   :  { %220 = vsyncadd [#allocation4], 4294967232 }
  0x43   :  { %142 = vsyncpa [#allocation3], 1 }
  0x44   :  { %143 = vsyncpa [#allocation6], 1 }
  0x45   :  { %144 = vsyncpa [#allocation4], 1 }

</bundles_post_ra>
